<compile_context>
chip_gen: v7x
topology: tpu7x:2x2x1
jax: 0.10.0
libtpu: 0.0.40
codegen_flags: <defaults>
</compile_context>

<pallas_src>
import functools

import jax
import jax.numpy as jnp
from jax import lax
from jax.experimental import pallas as pl
from jax.experimental.pallas import tpu as pltpu


def _round_up(x, m):
    return (x + m - 1) // m * m


def _vmem_capacity_bytes():
    """Generation-aware VMEM capacity (v5e/v6e: 128 MiB, v7x: 64 MiB)."""
    try:
        cap = int(pltpu.get_tpu_info().vmem_capacity_bytes)
        if cap > 0:
            return cap
    except Exception:
        pass
    return 64 * 1024 * 1024  # conservative fallback (v7x floor)


def _focal_factor(one_minus_pt, gamma):
    """(1 - pt) ** gamma.

    Integer gammas are unrolled into VPU multiplies (co-issue cheaply, avoid
    the exp(gamma*log(x)) lowering and its -inf intermediate when pt == 1).
    """
    g = float(gamma)
    if g == 0.0:
        return jnp.ones_like(one_minus_pt)
    if g.is_integer() and 0.0 < g <= 8.0:
        acc = one_minus_pt
        for _ in range(int(g) - 1):
            acc = acc * one_minus_pt
        return acc
    # Float exponent: clamp the base so a tiny negative rounding of (1 - pt)
    # cannot NaN through exp(gamma * log(x)).
    return jnp.power(jnp.maximum(one_minus_pt, 0.0), g)


def _focal_loss_kernel(*refs, gamma, has_alpha):
    """Per-sample focal loss for one (TN, C) tile of the batch.

    logits_ref : (TN, C) native dtype (f32/bf16) VMEM
    targets_ref: (TN, 1) int32 VMEM
    wt_ref     : (TN, 1) f32 VMEM  (alpha[target], only when has_alpha)
    out_ref    : (TN, 1) f32 VMEM  (per-sample focal loss, reduction='none')
    """
    if has_alpha:
        logits_ref, targets_ref, wt_ref, out_ref = refs
    else:
        logits_ref, targets_ref, out_ref = refs
        wt_ref = None

    x = logits_ref[...].astype(jnp.float32)  # cast in-kernel; HBM side stays native dtype
    t = targets_ref[...]                     # (TN, 1) int32
    tn, c = x.shape

    # Numerically stable log-sum-exp along the class (lane) axis.
    m = jnp.max(x, axis=-1, keepdims=True)
    lse = m + jnp.log(jnp.sum(jnp.exp(x - m), axis=-1, keepdims=True))    # (TN, 1)

    # Single masked gather of the target logit (no full log_probs tensor).
    onehot = lax.broadcasted_iota(jnp.int32, (tn, c), 1) == t             # (TN, C)
    x_t = jnp.sum(jnp.where(onehot, x, 0.0), axis=-1, keepdims=True)      # (TN, 1)

    # F.cross_entropy(..., weight=alpha, reduction='none'):
    #   ce_i = -alpha[target_i] * (x_i[target_i] - lse_i)
    ce = lse - x_t
    if has_alpha:
        ce = wt_ref[...] * ce

    # NOTE: pt = exp(-ce) with ce already scaled by alpha matches the PyTorch
    # FocalLoss module being ported (known quirk of that implementation); it is
    # not the canonical focal-loss definition when alpha is provided.
    pt = jnp.exp(-ce)
    out_ref[...] = _focal_factor(1.0 - pt, gamma) * ce


def _choose_block_rows(n, c, itemsize):
    """Pick the batch tile size TN (multiple of 8)."""
    c_pad = _round_up(c, 128)  # VMEM pads the lane dimension to 128
    # VMEM-resident bytes per batch row:
    #   2x double-buffered native-dtype logits tile (lane-padded)
    # + ~4x f32 temporaries the body materializes (f32 upcast of x, x - m,
    #   exp(x - m), onehot/where select)
    # + small lane-padded (TN, 1) buffers (targets / w_t / out, double-buffered).
    bytes_per_row = 2 * c_pad * itemsize + 4 * c_pad * 4 + 6 * 128 * 4

    vmem_budget = int(_vmem_capacity_bytes() * 0.6)  # headroom for Mosaic internals
    max_rows_vmem = max(8, vmem_budget // bytes_per_row)

    # >= ~2 MiB of logits per tile per buffer to amortize the ~0.35 us fixed
    # per-grid-step overhead ...
    target_rows_bw = max(8, (2 * 1024 * 1024) // max(1, c * itemsize))

    # ... but keep >= ~8 tiles when the batch allows it, so the "parallel"
    # batch axis can be sharded across v7x's two TensorCores.
    min_tiles = 8 if n >= 64 else max(1, n // 8)
    max_rows_split = max(8, n // max(1, min_tiles))

    tn = min(max_rows_vmem, target_rows_bw, max_rows_split, _round_up(n, 8))
    return max(8, (tn // 8) * 8)


def focal_loss(logits, targets, alpha=None, gamma=2.0, reduction="mean",
               block_rows=None):
    """JAX/Pallas equivalent of FocalLoss(alpha, gamma, reduction)(logits, targets)."""
    n, c = logits.shape
    itemsize = jnp.dtype(logits.dtype).itemsize
    if block_rows is None:
        block_rows = _choose_block_rows(n, c, itemsize)
    assert block_rows % 8 == 0, "block_rows must be a multiple of 8"

    # No padding copy: cdiv grid, partial boundary block. OOB tail rows are
    # computed on unspecified data but never affect valid rows (no cross-row
    # reduction in-kernel) and are discarded on writeback.
    grid = (pl.cdiv(n, block_rows),)
    targets_2d = targets.astype(jnp.int32).reshape(n, 1)

    in_specs = [
        pl.BlockSpec((block_rows, c), lambda i: (i, 0)),
        pl.BlockSpec((block_rows, 1), lambda i: (i, 0)),
    ]
    args = [logits, targets_2d]
    has_alpha = alpha is not None
    if has_alpha:
        # Tiny (N,) gather from a (C,) vector in the wrapper; ~4 bytes/row of
        # extra HBM instead of a (TN, C) select + cross-lane reduce per tile.
        alpha_arr = jnp.asarray(alpha, dtype=jnp.float32).reshape(c)
        w_t = alpha_arr[targets.astype(jnp.int32)].reshape(n, 1)
        in_specs.append(pl.BlockSpec((block_rows, 1), lambda i: (i, 0)))
        args.append(w_t)

    vmem_limit = int(min(_vmem_capacity_bytes() * 0.75, 112 * 1024 * 1024))

    per_sample = pl.pallas_call(
        functools.partial(_focal_loss_kernel, gamma=float(gamma),
                          has_alpha=has_alpha),
        out_shape=jax.ShapeDtypeStruct((n, 1), jnp.float32),
        grid=grid,
        in_specs=in_specs,
        out_specs=pl.BlockSpec((block_rows, 1), lambda i: (i, 0)),
        compiler_params=pltpu.CompilerParams(
            dimension_semantics=("parallel",),
            vmem_limit_bytes=vmem_limit),
    )(*args)

    # TODO(synk): for vocab-scale C, add an inner "arbitrary" class grid axis
    # with an online (streaming) LSE instead of loading full (TN, C) rows.
    per_sample = per_sample[:, 0]
    if reduction == "mean":
        return jnp.mean(per_sample)
    elif reduction == "sum":
        return jnp.sum(per_sample)
    return per_sample


def _reference_focal_loss(logits, targets, alpha=None, gamma=2.0, reduction="mean"):
    """Pure-JAX reference for sanity checking."""
    log_probs = jax.nn.log_softmax(logits.astype(jnp.float32), axis=-1)
    logp_t = jnp.take_along_axis(
        log_probs, targets[:, None].astype(jnp.int32), axis=-1)[:, 0]
    if alpha is None:
        w_t = jnp.ones_like(logp_t)
    else:
        w_t = jnp.asarray(alpha, jnp.float32)[targets]
    ce = -w_t * logp_t
    pt = jnp.exp(-ce)
    focal = (1.0 - pt) ** gamma * ce
    if reduction == "mean":
        return jnp.mean(focal)
    elif reduction == "sum":
        return jnp.sum(focal)
    return focal


if __name__ == "__main__":
    key = jax.random.PRNGKey(0)
    k_logits, k_targets, k_alpha = jax.random.split(key, 3)

    # Small classification-head shapes: batch=32, num_labels=8.
    N, C = 32, 8
    logits = jax.random.normal(k_logits, (N, C), dtype=jnp.float32) * 2.0
    targets = jax.random.randint(k_targets, (N,), 0, C, dtype=jnp.int32)
    alpha = jax.random.uniform(k_alpha, (C,), jnp.float32, 0.5, 1.5)

    # 1) Default module config (alpha=None, gamma=2.0, 'mean'); small block to
    #    exercise the multi-tile pipelined grid.
    out = focal_loss(logits, targets, gamma=2.0, reduction="mean", block_rows=8)
    out = jax.block_until_ready(out)
    ref = _reference_focal_loss(logits, targets, gamma=2.0, reduction="mean")
    assert jnp.allclose(out, ref, atol=1e-5, rtol=1e-5), (out, ref)

    # 2) N not a multiple of block_rows (partial tail block, no pad copy),
    #    per-class alpha weights, 'sum' reduction.
    N2 = 27
    out2 = focal_loss(logits[:N2], targets[:N2], alpha=alpha, gamma=2.0,
                      reduction="sum", block_rows=8)
    out2 = jax.block_until_ready(out2)
    ref2 = _reference_focal_loss(logits[:N2], targets[:N2], alpha=alpha,
                                 gamma=2.0, reduction="sum")
    assert jnp.allclose(out2, ref2, atol=1e-4, rtol=1e-5), (out2, ref2)

    # 3) bf16 logits kept native across the pallas_call boundary, non-integer
    #    gamma, reduction='none', auto-sized block_rows.
    logits_bf16 = logits.astype(jnp.bfloat16)
    out3 = focal_loss(logits_bf16, targets, gamma=1.5, reduction="none")
    out3 = jax.block_until_ready(out3)
    ref3 = _reference_focal_loss(logits_bf16.astype(jnp.float32), targets,
                                 gamma=1.5, reduction="none")
    assert jnp.allclose(out3, ref3, atol=1e-4, rtol=1e-4), (out3, ref3)

    print("KERNEL_OK")
</pallas_src>

<mosaic_0001>
module attributes {stable_mosaic.version = 11 : i64} {
  func.func @_focal_loss_kernel(%arg0: i32, %arg1: memref<8x8xf32, #tpu.memory_space<vmem>>, %arg2: memref<8x1xi32, #tpu.memory_space<vmem>>, %arg3: memref<8x1xf32, #tpu.memory_space<vmem>>) attributes {dimension_semantics = [#tpu.dimension_semantics<parallel>], iteration_bounds = array<i64: 4>, scalar_prefetch = 0 : i64, scratch_operands = 0 : i64, tpu.core_type = #tpu.core_type<tc>, window_params = [{transform_indices = @transform_0, window_bounds = array<i64: 8, 8>}, {transform_indices = @transform_1, window_bounds = array<i64: 8, 1>}, {transform_indices = @transform_2, window_bounds = array<i64: 8, 1>}]} {
    %c0 = arith.constant 0 : index
    %c0_0 = arith.constant 0 : index
    %0 = vector.load %arg1[%c0, %c0_0] : memref<8x8xf32, #tpu.memory_space<vmem>>, vector<8x8xf32>
    %c0_1 = arith.constant 0 : index
    %c0_2 = arith.constant 0 : index
    %1 = vector.load %arg2[%c0_1, %c0_2] : memref<8x1xi32, #tpu.memory_space<vmem>>, vector<8x1xi32>
    %cst = arith.constant dense<0xFF800000> : vector<8xf32>
    %2 = vector.multi_reduction <maximumf>, %0, %cst [1] : vector<8x8xf32> to vector<8xf32>
    %3 = vector.shape_cast %2 : vector<8xf32> to vector<8x1xf32>
    %4 = vector.broadcast %3 : vector<8x1xf32> to vector<8x8xf32>
    %5 = arith.subf %0, %4 : vector<8x8xf32>
    %6 = math.exp %5 : vector<8x8xf32>
    %cst_3 = arith.constant dense<0.000000e+00> : vector<8xf32>
    %7 = vector.multi_reduction <add>, %6, %cst_3 [1] : vector<8x8xf32> to vector<8xf32>
    %8 = vector.shape_cast %7 : vector<8xf32> to vector<8x1xf32>
    %9 = math.log %8 : vector<8x1xf32>
    %10 = arith.addf %3, %9 : vector<8x1xf32>
    %11 = tpu.iota {dimensions = array<i32: 1>} : vector<8x8xi32>
    %12 = vector.broadcast %1 : vector<8x1xi32> to vector<8x8xi32>
    %13 = arith.cmpi eq, %11, %12 : vector<8x8xi32>
    %cst_4 = arith.constant 0.000000e+00 : f32
    %14 = vector.broadcast %cst_4 : f32 to vector<8x8xf32>
    %15 = arith.select %13, %0, %14 : vector<8x8xi1>, vector<8x8xf32>
    %cst_5 = arith.constant dense<0.000000e+00> : vector<8xf32>
    %16 = vector.multi_reduction <add>, %15, %cst_5 [1] : vector<8x8xf32> to vector<8xf32>
    %17 = vector.shape_cast %16 : vector<8xf32> to vector<8x1xf32>
    %18 = arith.subf %10, %17 : vector<8x1xf32>
    %cst_6 = arith.constant 0.000000e+00 : f32
    %19 = vector.broadcast %cst_6 : f32 to vector<8x1xf32>
    %20 = arith.subf %19, %18 : vector<8x1xf32>
    %21 = math.exp %20 : vector<8x1xf32>
    %cst_7 = arith.constant 1.000000e+00 : f32
    %22 = vector.broadcast %cst_7 : f32 to vector<8x1xf32>
    %23 = arith.subf %22, %21 : vector<8x1xf32>
    %24 = arith.mulf %23, %23 : vector<8x1xf32>
    %25 = arith.mulf %24, %18 : vector<8x1xf32>
    %c0_8 = arith.constant 0 : index
    %c0_9 = arith.constant 0 : index
    %26 = vector.load %arg3[%c0_8, %c0_9] : memref<8x1xf32, #tpu.memory_space<vmem>>, vector<8x1xf32>
    tpu.vector_store %arg3[%c0_8, %c0_9], %25 {strides = array<i32>} : memref<8x1xf32, #tpu.memory_space<vmem>>, vector<8x1xf32>,
    return
  }
  func.func @transform_0(%arg0: i32) -> (i32, i32) {
    %c0_i32 = arith.constant 0 : i32
    %c0_i32_0 = arith.constant 0 : i32
    return %arg0, %c0_i32 : i32, i32
  }
  func.func @transform_1(%arg0: i32) -> (i32, i32) {
    %c0_i32 = arith.constant 0 : i32
    %c0_i32_0 = arith.constant 0 : i32
    return %arg0, %c0_i32 : i32, i32
  }
  func.func @transform_2(%arg0: i32) -> (i32, i32) {
    %c0_i32 = arith.constant 0 : i32
    %c0_i32_0 = arith.constant 0 : i32
    return %arg0, %c0_i32 : i32, i32
  }
}

</mosaic_0001>

<bundles_post_ra>
// kernel: tpu_custom_call.1
= control target key start
LH: loop header
LB: loop body
LE: loop exit
PB: predicated region body
PF: predicated region fallthrough
CT: control target
= control target key end

     0   :  { %s305_s9 = smov 0   ;;  %s333_s0 = inlined_call_operand.vmem [shape: f32[32,8], index: 0, kind: input, shape index: {}]   ;;  %s334_s1 = inlined_call_operand.vmem [shape: s32[32,1], index: 1, kind: input, shape index: {}]   ;;  %s335_s2 = inlined_call_operand.vmem [shape: f32[32,1], index: 2, kind: output, shape index: {}]  }
   0x1 LB: > { %s255_s10 = sadd.s32 4294967295, %s287_s9   ;;  %p259_p0 = scmp.ge.s32.totalorder %s287_s9, 1  ;;  %s287_s9 = sphi %s305_s9, %s12_s9  }
   0x2   : > { %p120_p1 = scmp.lt.s32.totalorder %s287_s9, 5 }
   0x4   : > { %p121_p2 = pnand %p259_p0, %p120_p1 }
   0x5   : > { %p144_p3 = scmp.lt.s32.totalorder (!%p121_p2), %s255_s10, 3  ;;  %v289_v0 = vmov (!%p121_p2), 0   ;;  %vm158_vm0 = vcmask (!%p121_p2), 64512   ;;  %v171_v7 = vlaneseq (!%p121_p2)  ;;  %vm188_vm2 = vcmask (!%p121_p2), 7168  }
   0x6   : > { %124 = sbr.rel (%p121_p2) target bundleno = 357 (0x165), region = 28  ;;  %274 = vset.pattern.permute.xlu0 (!%p121_p2), %v289_v0 }
   0x7   : > { %v172_v8 = vand.u32 (!%p121_p2), 127, %v171_v7 }
   0xd   : > { %s337_s10 = smov (!%p144_p3, %s255_s10), 3 }
   0xe   : > { %s313_s11 = sshll.u32 %s337_s10, 3 }
   0xf   : > { %s147_s14 = scalar_lea.vmem %s333_s0, %s313_s11  ;;  %s151_s17 = scalar_lea.vmem %s334_s1, %s313_s11 }
  0x10   : > { %v156_v1 = vld [vmem:[%s147_s14] sm:$0xff]  ;;  %s155_s20 = scalar_lea.vmem %s335_s2, %s313_s11 }
  0x11   : > { %v159_v2 = vsel %vm158_vm0, %v156_v1, -inf  ;;  %v157_v3 = vld [vmem:[%s151_s17] sm:$0xff] }
  0x12   : > { %160 = vmax.xlane.f32.xlu0 %v159_v2 }
  0x28   : > { %174 = vperm.xlu0 %274, %v157_v3  }
  0x9f   : > { %v161_v4 = vpop.xlane.xlu0 %160 }
  0xa0   : > { %v162_v5 = vsub.f32 %v156_v1, %v161_v4 }
  0xa2   : > { %v163_v6 = vmul.f32 1.442695, %v162_v5 }
  0xa4   : > { %275 = vpow2.f32 %v163_v6 }
  0xa7   : > { %v175_v9 = vpop.permute.xlu0 %174 }
  0xa8   : > { %vm176_vm1 = vcmp.eq.s32.totalorder %v172_v8, %v175_v9 }
  0xa9   : > { %v177_v11 = vsel %vm176_vm1, %v156_v1, 0.0 }
  0xaa   : > { %v178_v13 = vsel %vm158_vm0, %v177_v11, 0.0 }
  0xae   : > { %v276_v10 = vpop.eup %275 }
  0xaf   : > { %v165_v12 = vsel %vm158_vm0, %v276_v10, 0.0 }
  0xb0   : > { %166 = vadd.xlane.f32.xlu1 %v165_v12 }
  0xb4   : > { %179 = vadd.xlane.f32.xlu1 %v178_v13 }
 0x13d   : > { %v167_v14 = vpop.xlane.xlu1 %166 }
 0x13e   : > { %277 = vlog2.f32 %v167_v14 }
 0x141   : > { %v180_v17 = vpop.xlane.xlu1 %179 }
 0x148   : > { %v278_v15 = vpop.eup %277 }
 0x149   : > { %v169_v16 = vmul.f32 0.6931472, %v278_v15 }
 0x14b   : > { %v170_v18 = vadd.f32 %v169_v16, %v161_v4 }
 0x14d   : > { %v181_v19 = vsub.f32 %v170_v18, %v180_v17 }
 0x14f   : > { %v182_v20 = vsub.f32 0.0, %v181_v19 }
 0x151   : > { %v183_v21 = vmul.f32 1.442695, %v182_v20 }
 0x153   : > { %279 = vpow2.f32 %v183_v21 }
 0x15d   : > { %v280_v22 = vpop.eup %279 }
 0x15e   : > { %v185_v23 = vsub.f32 1.0, %v280_v22 }
 0x160   : > { %v186_v24 = vmul.f32 %v185_v23, %v185_v23 }
 0x162   : > { %v187_v25 = vmul.f32 %v186_v24, %v181_v19 }
 0x164   : > { %189 = vst.msk [vmem:[%s155_s20] sm:$0xff] %vm188_vm2, %v187_v25 }
 0x165 PF: > { %s12_s9 = sadd.s32 1, %s287_s9  }
 0x166   : > { %p9_p4 = scmp.ge.s32.totalorder %s12_s9, 6  }
 0x168   :  { %11 = sbr.rel (!%p9_p4) target bundleno = 1 (0x1), region = 61 }

</bundles_post_ra>
